<compile_context>
chip_gen: v7x
topology: tpu7x:2x2x1
jax: 0.10.0
libtpu: 0.0.40
codegen_flags: <defaults>
</compile_context>

<pallas_src>
import math

import jax
import jax.numpy as jnp
from jax.experimental import pallas as pl
from jax.experimental.pallas import tpu as pltpu

_MIB = 1024 * 1024


def snake_ref(x, alpha=1.0):
    return x + (1.0 / alpha) * jnp.sin(alpha * x) ** 2


def _sublane_multiple(dtype):
    return {4: 8, 2: 16, 1: 32}.get(jnp.dtype(dtype).itemsize, 8)


def _tpu_generation():
    """Best-effort TPU generation (7/6/5/4) from device_kind; 0 if unknown."""
    try:
        kind = jax.devices()[0].device_kind.lower()
    except Exception:
        return 0
    for gen, tags in ((7, ("v7", "7x")), (6, ("v6",)), (5, ("v5",)), (4, ("v4",))):
        if any(t in kind for t in tags):
            return gen
    return 0


def _block_budget(gen):
    """(block_bytes, vmem_limit_bytes) per generation.

    Double-buffered in+out footprint ~= 4x block_bytes; keep it comfortably
    under the scoped-VMEM budget (v5e 16 MiB default, v6e 32 MiB, v7x 64 MiB
    physical per TC).
    """
    if gen >= 7:
        return 6 * _MIB, 48 * _MIB
    if gen == 6:
        return 4 * _MIB, 32 * _MIB
    return 2 * _MIB, None            # v5e / older / unknown: stay under defaults


def _native_compute(dtype, gen):
    # v6e/v7x VPU has bf16; v5e does not -> upcast to f32 there.
    return gen >= 6 and jnp.dtype(dtype) == jnp.dtype(jnp.bfloat16)


def _make_kernel(native_compute):
    def kernel(alpha_ref, x_ref, o_ref):
        alpha = alpha_ref[0]                     # f32 scalar from SMEM
        x = x_ref[...]
        if native_compute:
            # bf16 path (v6e/v7x): keep VALU muls/adds in bf16, transcendental
            # in f32.  Use sin^2 directly -- (1 - cos) cancels at bf16.
            a = alpha.astype(x.dtype)
            inv_a = (1.0 / alpha).astype(x.dtype)
            s = jnp.sin((a * x).astype(jnp.float32))
            o_ref[...] = x + inv_a * (s * s).astype(x.dtype)
        else:
            # f32 path: sin^2 == 0.5*(1 - cos(2ax)) -> one EUP transcendental.
            xf = x.astype(jnp.float32)
            y = xf + (0.5 / alpha) * (1.0 - jnp.cos((2.0 * alpha) * xf))
            o_ref[...] = y.astype(o_ref.dtype)
    return kernel


def _snake_2d(x2, alpha_arr):
    """Snake over a 2-D view.  Callers guarantee cols % 128 == 0 (lane dense)."""
    rows, cols = x2.shape
    itemsize = jnp.dtype(x2.dtype).itemsize
    sub = _sublane_multiple(x2.dtype)
    gen = _tpu_generation()
    block_bytes, vmem_limit = _block_budget(gen)

    if cols % 128 == 0:
        bc = min(cols, max(128, (block_bytes // (sub * itemsize)) // 128 * 128))
    else:
        bc = cols                    # full (unaligned) rows; only tiny inputs land here
    rows_budget = max(sub, block_bytes // max(1, bc * itemsize))
    br = rows if rows_budget >= rows else max(sub, (rows_budget // sub) * sub)

    # v7x megacore: a mid-sized tensor that fits one block would serialize onto
    # a single TC; split rows so the grid has >= 2 "parallel" programs.
    if (gen >= 7 and rows * cols * itemsize >= _MIB and rows >= 2 * sub
            and pl.cdiv(rows, br) * pl.cdiv(cols, bc) < 2):
        br = min(rows, pl.cdiv(pl.cdiv(rows, 2), sub) * sub)

    grid = (pl.cdiv(rows, br), pl.cdiv(cols, bc))
    return pl.pallas_call(
        _make_kernel(_native_compute(x2.dtype, gen)),
        out_shape=jax.ShapeDtypeStruct((rows, cols), x2.dtype),
        grid=grid,
        in_specs=[pl.BlockSpec(memory_space=pltpu.MemorySpace.SMEM),
                  pl.BlockSpec((br, bc), lambda i, j: (i, j))],
        out_specs=pl.BlockSpec((br, bc), lambda i, j: (i, j)),
        compiler_params=pltpu.CompilerParams(
            dimension_semantics=("parallel", "parallel"),
            vmem_limit_bytes=vmem_limit,
        ),
    )(alpha_arr, x2)


def snake(x, alpha=1.0):
    """Snake activation, elementwise over any shape (e.g. NCT)."""
    orig_shape = x.shape
    n = x.size
    if n == 0:
        return x
    # SMEM scalar: no recompile per distinct alpha, and traced alpha is fine.
    # TODO(synk): per-channel learnable alpha would broadcast a (C,) vector here.
    alpha_arr = jnp.reshape(jnp.asarray(alpha, dtype=jnp.float32), (1,))

    # (a) Trailing dim already lane aligned: collapse leading dims (free reshape).
    if x.ndim >= 2 and orig_shape[-1] % 128 == 0:
        rows = int(math.prod(orig_shape[:-1]))
        y = _snake_2d(jnp.reshape(x, (rows, orig_shape[-1])), alpha_arr)
        return jnp.reshape(y, orig_shape)

    # (b) Elementwise -> fully flatten into a lane-dense slab (free reshape).
    for lane in (1024, 512, 256, 128):
        if n % lane == 0:
            y = _snake_2d(jnp.reshape(x, (n // lane, lane)), alpha_arr)
            return jnp.reshape(y, orig_shape)

    # (c) Total size not a multiple of 128: aligned prefix through the kernel,
    #     tiny (<128 element) tail in plain jnp.  No pad/slice round trips.
    flat = jnp.reshape(x, (n,))
    split = (n // 128) * 128
    tail = snake_ref(flat[split:], alpha)
    if split == 0:
        return jnp.reshape(tail, orig_shape)
    head = _snake_2d(jnp.reshape(flat[:split], (split // 128, 128)), alpha_arr)
    out = jnp.concatenate([jnp.reshape(head, (split,)), tail])
    return jnp.reshape(out, orig_shape)


if __name__ == "__main__":
    # NCT input consistent with residual-block usage: batch=2, channels=4, time=16.
    x = jax.random.normal(jax.random.PRNGKey(0), (2, 4, 16), dtype=jnp.float32)
    y = jax.block_until_ready(snake(x, 1.0))
    assert y.shape == x.shape and y.dtype == x.dtype
    assert jnp.allclose(y, snake_ref(x, 1.0), atol=1e-5, rtol=1e-5), "NCT mismatch"

    # Lane-aligned trailing dim, alpha != 1 -> 2-D collapse fast path.
    x2 = jax.random.normal(jax.random.PRNGKey(1), (2, 4, 256), dtype=jnp.float32)
    y2 = jax.block_until_ready(snake(x2, 0.5))
    assert jnp.allclose(y2, snake_ref(x2, 0.5), atol=1e-5, rtol=1e-5), "aligned mismatch"

    # Unaligned total size -> aligned-prefix kernel + tiny jnp tail.
    x3 = jax.random.normal(jax.random.PRNGKey(2), (3, 5, 100), dtype=jnp.float32)
    y3 = jax.block_until_ready(snake(x3, 2.0))
    assert jnp.allclose(y3, snake_ref(x3, 2.0), atol=1e-5, rtol=1e-5), "ragged mismatch"

    # bf16 (exercises the native bf16 VPU path on v6e/v7x); loose tolerance.
    x4 = jax.random.normal(jax.random.PRNGKey(3), (4, 8, 512), dtype=jnp.bfloat16)
    y4 = jax.block_until_ready(snake(x4, 1.0))
    ref4 = snake_ref(x4.astype(jnp.float32), 1.0)
    assert y4.dtype == jnp.bfloat16
    assert jnp.allclose(y4.astype(jnp.float32), ref4, atol=5e-2, rtol=5e-2), "bf16 mismatch"

    # Multi-block grid sanity check (~8 MiB, exercises the tiled stream).
    x5 = jax.random.normal(jax.random.PRNGKey(4), (2, 2048, 512), dtype=jnp.float32)
    y5 = jax.block_until_ready(snake(x5, 1.0))
    assert jnp.allclose(y5, snake_ref(x5, 1.0), atol=1e-5, rtol=1e-5), "tiled mismatch"

    print("KERNEL_OK")
</pallas_src>

<mosaic_0001>
module attributes {stable_mosaic.version = 11 : i64} {
  func.func @kernel(%arg0: i32, %arg1: i32, %arg2: memref<1xf32, #tpu.memory_space<smem>>, %arg3: memref<1x128xf32, #tpu.memory_space<vmem>>, %arg4: memref<1x128xf32, #tpu.memory_space<vmem>>) attributes {dimension_semantics = [#tpu.dimension_semantics<parallel>, #tpu.dimension_semantics<parallel>], iteration_bounds = array<i64: 1, 1>, scalar_prefetch = 0 : i64, scratch_operands = 0 : i64, tpu.core_type = #tpu.core_type<tc>, window_params = [{transform_indices = @transform_0, window_bounds = array<i64: 1>}, {transform_indices = @transform_1, window_bounds = array<i64: 1, 128>}, {transform_indices = @transform_2, window_bounds = array<i64: 1, 128>}]} {
    %c0 = arith.constant 0 : index
    %0 = memref.load %arg2[%c0] : memref<1xf32, #tpu.memory_space<smem>>
    %c0_0 = arith.constant 0 : index
    %c0_1 = arith.constant 0 : index
    %1 = vector.load %arg3[%c0_0, %c0_1] : memref<1x128xf32, #tpu.memory_space<vmem>>, vector<1x128xf32>
    %cst = arith.constant 5.000000e-01 : f32
    %2 = arith.divf %cst, %0 : f32
    %cst_2 = arith.constant 2.000000e+00 : f32
    %3 = arith.mulf %cst_2, %0 : f32
    %4 = vector.broadcast %3 : f32 to vector<1x128xf32>
    %5 = arith.mulf %4, %1 : vector<1x128xf32>
    %6 = math.cos %5 : vector<1x128xf32>
    %cst_3 = arith.constant 1.000000e+00 : f32
    %7 = vector.broadcast %cst_3 : f32 to vector<1x128xf32>
    %8 = arith.subf %7, %6 : vector<1x128xf32>
    %9 = vector.broadcast %2 : f32 to vector<1x128xf32>
    %10 = arith.mulf %9, %8 : vector<1x128xf32>
    %11 = arith.addf %1, %10 : vector<1x128xf32>
    %c0_4 = arith.constant 0 : index
    %c0_5 = arith.constant 0 : index
    %12 = vector.load %arg4[%c0_4, %c0_5] : memref<1x128xf32, #tpu.memory_space<vmem>>, vector<1x128xf32>
    tpu.vector_store %arg4[%c0_4, %c0_5], %11 {strides = array<i32>} : memref<1x128xf32, #tpu.memory_space<vmem>>, vector<1x128xf32>,
    return
  }
  func.func @transform_0(%arg0: i32, %arg1: i32) -> i32 {
    %c0_i32 = arith.constant 0 : i32
    %c0_i32_0 = arith.constant 0 : i32
    return %c0_i32 : i32
  }
  func.func @transform_1(%arg0: i32, %arg1: i32) -> (i32, i32) {
    %c0_i32 = arith.constant 0 : i32
    return %arg0, %arg1 : i32, i32
  }
  func.func @transform_2(%arg0: i32, %arg1: i32) -> (i32, i32) {
    %c0_i32 = arith.constant 0 : i32
    return %arg0, %arg1 : i32, i32
  }
}

</mosaic_0001>

<bundles_post_ra>
// kernel: tpu_custom_call.1
= control target key start
LH: loop header
LB: loop body
LE: loop exit
PB: predicated region body
PF: predicated region fallthrough
CT: control target
= control target key end

     0   :  { %s259_s0 = inlined_call_operand.<no memory space> [shape: f32[1], index: 0, kind: input, shape index: {}]   ;;  %s260_s1 = inlined_call_operand.vmem [shape: f32[1,128], index: 1, kind: input, shape index: {}]   ;;  %s261_s2 = inlined_call_operand.hbm [shape: f32[1,128], index: 2, kind: output, shape index: {}]  }
   0x1   :  { %v15_v0 = vstv %s259_s0  ;;  %v219_v1 = vld [vmem:[%s260_s1] sm:$0x1]  ;;  %s19_s15 = smul.f32 2.0, %s259_s0 }
   0x2   :  { %161 = vrcp.f32 %v15_v0 }
   0x3   :  { %v20_v2 = vstv %s19_s15 }
   0x4   :  { %8 = vsyncpa [#allocation4], 0  ;;  %v225_v3 = vmul.f32 %v20_v2, %v219_v1  ;;  %v191_v16 = vmov 683565275   ;;  %v192_v18 = vmov 2475754826  }
   0x5   :  { %v193_v20 = vmov 2131351028   ;;  %v194_v22 = vmov 2102212464   ;;  %v195_v24 = vmov 920167782  }
   0x6   :  { %v25_v4 = vand.u32 2139095040, %v225_v3  ;;  %v22_v6 = vand.u32 2147483647, %v225_v3  ;;  %v196_v31 = vmov 1326507024   ;;  %vm24_vm7 = vcmp.lt.s32.totalorder %v225_v3, 0 }
   0x7   :  { %vm114_vm12 = vweird.f32 %v225_v3  ;;  %s197_s16 = smov [#allocation3]  }
   0x8   :  { %v26_v5 = vshrl.u32 %v25_v4, 23  ;;  %v29_v10 = vand.u32 8388607, %v22_v6  ;;  %vm23_vm8 = vcmp.le.f32.partialorder %v22_v6, 0.7853982  ;;  %s136_s17 = sshll.u32 %s197_s16, 4  ;;  %s137_s17 = int_to_ptr.vmem [resolvable:$true] %s136_s17 }
   0x9   :  { %s167_s18 = scalar_lea.vmem %s137_s17, 16  ;;  %s171_s19 = scalar_lea.vmem %s137_s17, 32 }
   0xa   :  { %v144_v7 = vadd.s32 4294967169, %v26_v5  ;;  %v30_v13 = vor.u32 8388608, %v29_v10  ;;  %p168_p0 = scmp.ne.s32.totalorder %s137_s17, %s167_s18  ;;  %p172_p1 = scmp.lt.s32.totalorder %s137_s17, %s137_s17 }
   0xb   :  { %p173_p2 = scmp.lt.s32.totalorder %s171_s19, %s167_s18 }
   0xc   :  { %v162_v8 = vpop.eup %161  ;;  %v32_v9 = vadd.s32 1, %v144_v7  ;;  %v70_v33 = vshll.u32 %v30_v13, 8 }
   0xd   :  { %148 = vpush %v162_v8  ;;  %p174_p3 = por %p173_p2, %p172_p1 }
   0xe   :  { %vm33_vm0 = vcmp.gt.s32.totalorder %v32_v9, 0 }
   0xf   :  { %v34_v11 = vsel %vm33_vm0, %v32_v9, 0  ;;  %p175_p4 = pnand %p174_p3, %p168_p0 }
  0x10   :  { %v36_v12 = vand.u32 31, %v34_v11  ;;  %v35_v14 = vshrl.u32 %v34_v11, 5 }
  0x12   :  { %v37_v15 = vsub.s32 32, %v36_v12  ;;  %v39_v17 = vshll.u32 %v191_v16, %v36_v12  ;;  %v42_v19 = vshll.u32 %v192_v18, %v36_v12  ;;  %v45_v21 = vshll.u32 %v193_v20, %v36_v12 }
  0x13   :  { %v48_v23 = vshll.u32 %v194_v22, %v36_v12  ;;  %v51_v25 = vshll.u32 %v195_v24, %v36_v12  ;;  %vm54_vm1 = vcmp.lt.s32.totalorder %v35_v14, 1  ;;  %vm57_vm2 = vcmp.lt.s32.totalorder %v35_v14, 4 }
  0x14   :  { %v38_v26 = vshrl.u32 %v191_v16, %v37_v15  ;;  %v40_v27 = vshrl.u32 %v192_v18, %v37_v15  ;;  %v43_v28 = vshrl.u32 %v193_v20, %v37_v15  ;;  %v46_v29 = vshrl.u32 %v194_v22, %v37_v15 }
  0x15   :  { %v49_v30 = vshrl.u32 %v195_v24, %v37_v15  ;;  %v52_v32 = vshrl.u32 %v196_v31, %v37_v15  ;;  %vm55_vm3 = vcmp.lt.s32.totalorder %v35_v14, 2  ;;  %vm56_vm4 = vcmp.lt.s32.totalorder %v35_v14, 3 }
  0x16   :  { %v41_v34 = vor.u32 %v40_v27, %v39_v17  ;;  %v44_v35 = vor.u32 %v43_v28, %v42_v19  ;;  %v47_v36 = vor.u32 %v46_v29, %v45_v21 }
  0x17   :  { %v50_v37 = vor.u32 %v49_v30, %v48_v23  ;;  %v53_v38 = vor.u32 %v52_v32, %v51_v25 }
  0x18   :  { %v58_v39 = vsel %vm54_vm1, %v38_v26, %v41_v34  ;;  %v59_v40 = vsel %vm57_vm2, %v47_v36, 2102212464  ;;  %v62_v41 = vsel %vm54_vm1, %v41_v34, %v44_v35  ;;  %v66_v42 = vsel %vm54_vm1, %v44_v35, %v47_v36 }
  0x19   :  { %v60_v43 = vsel %vm56_vm4, %v44_v35, %v59_v40  ;;  %v63_v44 = vsel %vm57_vm2, %v50_v37, 920167782  ;;  %v67_v45 = vsel %vm57_vm2, %v53_v38, 1326507024 }
  0x1a   :  { %v64_v46 = vsel %vm56_vm4, %v47_v36, %v63_v44  ;;  %v68_v47 = vsel %vm56_vm4, %v50_v37, %v67_v45  ;;  %v61_v48 = vsel %vm55_vm3, %v58_v39, %v60_v43 }
  0x1b   :  { %v65_v49 = vsel %vm55_vm3, %v62_v41, %v64_v46  ;;  %v69_v50 = vsel %vm55_vm3, %v66_v42, %v68_v47  ;;  %v77_v55 = vmul.u32 %v70_v33, %v61_v48 }
  0x1c   :  { %v231_v51 = vmul.u32.u64.low %v70_v33, %v69_v50  ;;  %v232_v52 = vmul.u32.u64.high %v70_v33, %v69_v50, %v231_v51  ;;  %v234_v53 = vmul.u32.u64.low %v70_v33, %v65_v49  ;;  %v235_v54 = vmul.u32.u64.high %v70_v33, %v65_v49, %v234_v53 }
  0x1e   :  { %vm79_vm5 = vc.u32 %v232_v52, %v234_v53  ;;  %v80_v56 = vadd.s32 1, %v235_v54  ;;  %v78_v5 = vadd.s32 %v234_v53, %v232_v52 }
  0x20   :  { %v81_v57 = vsel %vm79_vm5, %v80_v56, %v235_v54 }
  0x21   :  { %v82_v58 = vadd.s32 %v81_v57, %v77_v55 }
  0x23   :  { %v83_v59 = vadd.s32 536870912, %v82_v58 }
  0x25   :  { %v84_v60 = vshrl.u32 %v83_v59, 30 }
  0x27   :  { %v85_v61 = vshll.u32 %v84_v60, 30  ;;  %v108_v20 = vsub.s32 4, %v84_v60 }
  0x29   :  { %v86_v62 = vsub.s32 %v82_v58, %v85_v61  ;;  %v109_v23 = vsel %vm24_vm7, %v108_v20, %v84_v60 }
  0x2a   :  { %v111_v24 = vsel %vm23_vm8, 0, %v109_v23 }
  0x2b   :  { %v88_v63 = vsub.s32 0, %v86_v62  ;;  %v115_v25 = vand.u32 3, %v111_v24 }
  0x2d   :  { %v145_v0 = vmin.u32 %v88_v63, %v86_v62  ;;  %vm120_vm9 = vcmp.eq.s32.totalorder %v115_v25, 2  ;;  %vm117_vm10 = vcmp.eq.s32.totalorder %v115_v25, 0  ;;  %vm116_vm11 = vcmp.lt.s32.totalorder %v115_v25, 2 }
  0x2f   :  { %v90_v2 = vclz %v145_v0 }
  0x31   :  { %v146_v4 = vadd.s32 4294967294, %v90_v2 }
  0x33   :  { %vm147_vm6 = vcmp.lt.s32.totalorder %v146_v4, 0 }
  0x34   :  { %v93_v7 = vsel %vm147_vm6, 0, %v146_v4 }
  0x35   :  { %v94_v8 = vsub.s32 32, %v93_v7  ;;  %v95_v9 = vshll.u32 %v86_v62, %v93_v7  ;;  %v98_v10 = vsub.s32 4294967266, %v93_v7 }
  0x37   :  { %v96_v11 = vshrl.u32 %v78_v5, %v94_v8  ;;  %v99_v12 = vadd.s32 127, %v98_v10 }
  0x39   :  { %v97_v13 = vor.u32 %v96_v11, %v95_v9  ;;  %v100_v14 = vshll.u32 %v99_v12, 23 }
  0x3b   :  { %v101_v15 = vor.u32 4788187, %v100_v14  ;;  %v104_v16 = vcvt.s32.f32 %v97_v13 }
  0x3d   :  { %v102_v17 = vand.u32 2147483647, %v101_v15 }
  0x3e   :  { %s149_s0 = spop %148 }
  0x3f   :  { %v105_v18 = vmul.f32 %v104_v16, %v102_v17  ;;  %s18_s1 = smul.f32 0.5, %s149_s0 }
  0x41   :  { %v106_v19 = vxor.u32 2147483648, %v105_v18  ;;  %v126_v33 = vstv %s18_s1 }
  0x43   :  { %v107_v21 = vsel %vm24_vm7, %v106_v19, %v105_v18 }
  0x44   :  { %v110_v22 = vsel %vm23_vm8, %v225_v3, %v107_v21 }
  0x45   :  { %163 = vcosq.f32 %v110_v22 }
  0x46   :  { %165 = vsinq.f32 %v110_v22 }
  0x4f   :  { %v164_v26 = vpop.eup %163 }
  0x50   :  { %v166_v27 = vpop.eup %165  ;;  %v121_v28 = vxor.u32 2147483648, %v164_v26 }
  0x51   :  { %v118_v29 = vxor.u32 2147483648, %v166_v27 }
  0x52   :  { %v122_v6 = vsel %vm120_vm9, %v121_v28, %v166_v27 }
  0x53   :  { %v119_v30 = vsel %vm117_vm10, %v164_v26, %v118_v29 }
  0x54   :  { %v123_v31 = vsel %vm116_vm11, %v119_v30, %v122_v6 }
  0x55   :  { %v124_v32 = vsel %vm114_vm12, nan, %v123_v31 }
  0x56   :  { %v125_v34 = vsub.f32 1.0, %v124_v32 }
  0x58   :  { %v127_v35 = vmul.f32 %v126_v33, %v125_v34 }
  0x5a   :  { %v128_v36 = vadd.f32 %v127_v35, %v219_v1 }
  0x5c   :  { %129 = vst [vmem:[#allocation3] sm:$0x1] %v128_v36 }
  0x5d   :  { %178 = shalt.err (!%p175_p4)
}
  0x5e   :  { %s179_s22 = scalar_lea.hbm %s261_s2, 16 }
  0x5f   :  { %p180_p5 = scmp.ne.s32.totalorder %s261_s2, %s179_s22  ;;  %p183_p6 = scmp.lt.u32.totalorder %s179_s22, %s261_s2 }
  0x61   :  { %p185_p7 = pnand %p183_p6, %p180_p5 }
  0x63   :  { %188 = shalt.err (!%p185_p7)
}
  0x64   :  { %139 = dma.vmem_to_hbm [thread:$0]  %s137_s17, 16, %s261_s2, [#allocation4]  }
  0x65   :  { %189 = dma.done.wait [#allocation4], 16  }
  0x66   :  { %190 = vsyncadd [#allocation4], 4294967280 }
  0x67   :  { %143 = vsyncpa [#allocation4], 1 }

</bundles_post_ra>
